<compile_context>
chip_gen: v7x
topology: tpu7x:2x2x1
jax: 0.10.0
libtpu: 0.0.40
codegen_flags: <defaults>
</compile_context>

<pallas_src>
import jax
import jax.numpy as jnp
from jax import lax
from jax.experimental import pallas as pl
from jax.experimental.pallas import tpu as pltpu


def _round_up(x, m):
    return ((x + m - 1) // m) * m


def _choose_tiles(batch, tm_max=512):
    """Pick (TM, num_tiles, B_pad).

    TM is a multiple of 16 (bf16 sublane tile), padding waste is bounded to
    <16 rows per tile (instead of round-up-to-TM), and we force >=2 tiles once
    there is enough work so dimension_semantics=("parallel",) can actually use
    both TensorCores on v7x.
    """
    b16 = _round_up(max(batch, 16), 16)
    min_tiles = 2 if b16 >= 512 else 1
    num_tiles = max(pl.cdiv(b16, tm_max), min_tiles)
    tm = _round_up(pl.cdiv(b16, num_tiles), 16)
    return tm, num_tiles, num_tiles * tm


# ----------------------------------------------------------------------------
# Pallas kernel: fused embedding-lookup + 4-layer MLP (folded BN) per batch tile
# ----------------------------------------------------------------------------
def _make_mlp_kernel(n_cat, cat_offsets):
    """Build a kernel closed over the (static) categorical layout."""

    def kernel(*refs):
        idx_refs = refs[:n_cat]
        if n_cat:
            (x_ref, t_ref, w1_ref, b1_ref, w2_ref, b2_ref,
             w3_ref, b3_ref, wo_ref, bo_ref, out_ref) = refs[n_cat:]
        else:
            (x_ref, w1_ref, b1_ref, w2_ref, b2_ref,
             w3_ref, b3_ref, wo_ref, bo_ref, out_ref) = refs
            t_ref = None

        tm = x_ref.shape[0]

        # ---- layer 1: numerical matmul + fused embedding lookup + BN shift ----
        h1 = jnp.dot(x_ref[...], w1_ref[...],
                     preferred_element_type=jnp.float32)          # (TM, 512)
        if n_cat:
            nc_total = t_ref.shape[0]
            iota = lax.broadcasted_iota(jnp.int32, (tm, nc_total), 1)
            onehot = None
            for j in range(n_cat):
                tgt = idx_refs[j][...] + cat_offsets[j]           # (TM, 1)
                m = iota == tgt                                   # (TM, NC)
                onehot = m if onehot is None else jnp.logical_or(onehot, m)
            onehot_b = jnp.where(onehot, 1.0, 0.0).astype(jnp.bfloat16)
            # E @ W1 was pre-folded into t_ref, so this IS the embedding lookup
            # plus its fc1 contribution, done on the MXU.
            h1 = h1 + jnp.dot(onehot_b, t_ref[...],
                              preferred_element_type=jnp.float32)
        h1 = jnp.maximum(h1 + b1_ref[...], 0.0)                   # (TM, 512) f32

        # ---- layer 2 ----
        h2 = jnp.dot(h1.astype(jnp.bfloat16), w2_ref[...],
                     preferred_element_type=jnp.float32)
        h2 = jnp.maximum(h2 + b2_ref[...], 0.0)                   # (TM, 256) f32

        # ---- layer 3 ----
        h3 = jnp.dot(h2.astype(jnp.bfloat16), w3_ref[...],
                     preferred_element_type=jnp.float32)
        h3 = jnp.maximum(h3 + b3_ref[...], 0.0)                   # (TM, 128) f32

        # ---- output layer (128 -> 1), lane-dense ----
        # wo_ref is (8, 128) f32 with the real weights in row 0 (rows 1..7 zero);
        # wo @ h3^T produces a lane-dense (., TM) row -> unmasked vector stores,
        # instead of a (TM, 1) masked-store column.
        out_rows = lax.dot_general(wo_ref[...], h3,
                                   (((1,), (1,)), ((), ())),
                                   preferred_element_type=jnp.float32)  # (8, TM)
        out_ref[...] = out_rows[0:1, :] + bo_ref[0, 0]            # (1, TM)

    return kernel


def fused_mlp(params, numerical_feats, cat_idx_list, *, tm_max=512):
    """numerical_feats: (B, Dn) f32.  cat_idx_list: list of (B,) int arrays."""
    B, Dn = numerical_feats.shape
    TM, num_tiles, B_pad = _choose_tiles(B, tm_max)
    n_cat = len(cat_idx_list)

    # Row-pad only (no 128-lane pad) and cast the MXU input to bf16.
    x = numerical_feats.astype(jnp.bfloat16)
    if B_pad != B:
        x = jnp.pad(x, ((0, B_pad - B), (0, 0)))
    idx_cols = []
    for idx in cat_idx_list:
        col = idx.astype(jnp.int32).reshape(B, 1)
        if B_pad != B:
            col = jnp.pad(col, ((0, B_pad - B), (0, 0)))
        idx_cols.append(col)

    def tile2(shape):
        return pl.BlockSpec(shape, lambda i: (i, 0))

    def resident(shape):
        return pl.BlockSpec(shape, lambda i: (0, 0))

    in_specs = [tile2((TM, 1)) for _ in range(n_cat)]
    args = list(idx_cols)
    in_specs.append(tile2((TM, Dn)))
    args.append(x)
    if n_cat:
        in_specs.append(resident(params["t_all"].shape))
        args.append(params["t_all"])
    for name in ("w1n", "b1", "w2", "b2", "w3", "b3", "wo"):
        in_specs.append(resident(params[name].shape))
        args.append(params[name])
    # Output bias: single scalar, kept in SMEM instead of a VMEM block.
    in_specs.append(pl.BlockSpec((1, 1), lambda i: (0, 0),
                                 memory_space=pltpu.MemorySpace.SMEM))
    args.append(params["bo"])

    # 3-D output so the kernel-visible block is exactly (1, TM) (lane-dense).
    out_specs = pl.BlockSpec((None, 1, TM), lambda i: (i, 0, 0))
    out_shape = jax.ShapeDtypeStruct((num_tiles, 1, TM), jnp.float32)

    nc_total = int(params["t_all"].shape[0]) if n_cat else 0
    flops = 2 * B_pad * (Dn * 512 + nc_total * 512 + 512 * 256 + 256 * 128 + 128)
    bytes_accessed = int(
        x.size * 2 + sum(c.size * 4 for c in idx_cols)
        + sum(int(params[n].size) * int(params[n].dtype.itemsize)
              for n in ("w1n", "b1", "w2", "b2", "w3", "b3", "wo", "bo"))
        + (int(params["t_all"].size) * 2 if n_cat else 0)
        + B_pad * 4)

    kernel = _make_mlp_kernel(n_cat, params["cat_offsets"])

    out = pl.pallas_call(
        kernel,
        grid=(num_tiles,),
        in_specs=in_specs,
        out_specs=out_specs,
        out_shape=out_shape,
        compiler_params=pltpu.CompilerParams(
            dimension_semantics=("parallel",),
            vmem_limit_bytes=32 * 1024 * 1024),
        cost_estimate=pl.CostEstimate(flops=int(flops), transcendentals=0,
                                      bytes_accessed=bytes_accessed),
    )(*args)
    return out.reshape(-1)[:B].reshape(B, 1)


# ----------------------------------------------------------------------------
# Parameter construction (deterministic, synthetic) + BN / embedding folding
# ----------------------------------------------------------------------------
def init_params(key, num_numerical_features, embedding_dims):
    keys = iter(jax.random.split(key, 64))
    eps = 1e-5
    params = {"embeddings": {}}
    cat_cols = sorted(embedding_dims.keys())
    embedding_output_dim = 0
    for col in cat_cols:
        num_categories, embed_dim = embedding_dims[col]
        params["embeddings"][col] = jax.random.normal(
            next(keys), (num_categories, embed_dim), jnp.float32)
        embedding_output_dim += embed_dim

    total_input_dim = num_numerical_features + embedding_output_dim

    def linear(din, dout):
        # PyTorch-style uniform(-1/sqrt(din), 1/sqrt(din))
        bound = 1.0 / float(din) ** 0.5
        w = jax.random.uniform(next(keys), (dout, din), jnp.float32, -bound, bound)
        b = jax.random.uniform(next(keys), (dout,), jnp.float32, -bound, bound)
        return w, b

    raw = {}
    raw["fc1_w"], raw["fc1_b"] = linear(total_input_dim, 512)
    raw["fc2_w"], raw["fc2_b"] = linear(512, 256)
    raw["fc3_w"], raw["fc3_b"] = linear(256, 128)
    raw["out_w"], raw["out_b"] = linear(128, 1)

    # BatchNorm1d eval-mode stats (weight=1, bias=0, mean=0, var=1): fold the
    # scale 1/sqrt(var+eps) into weight columns; only a per-output shift remains.
    inv_std = 1.0 / jnp.sqrt(1.0 + eps)

    def fold(w, b):
        return w.T * inv_std, (b * inv_std)[None, :]   # (din, dout) f32, (1, dout) f32

    w1_f32, params["b1"] = fold(raw["fc1_w"], raw["fc1_b"])
    w2_f32, params["b2"] = fold(raw["fc2_w"], raw["fc2_b"])
    w3_f32, params["b3"] = fold(raw["fc3_w"], raw["fc3_b"])
    params["w2"] = w2_f32.astype(jnp.bfloat16)
    params["w3"] = w3_f32.astype(jnp.bfloat16)

    # Fold each embedding table through its slice of the BN-scaled fc1 weight:
    #   T_col = E_col @ W1[rows(col), :]  -> (num_categories, 512)
    # so the in-kernel lookup becomes a one-hot matmul (no gather/concat/pad).
    t_blocks, offsets, sizes = [], [], []
    row, off = 0, 0
    for col in cat_cols:
        num_categories, embed_dim = embedding_dims[col]
        w1_slice = w1_f32[row:row + embed_dim]                    # (embed_dim, 512)
        t_blocks.append(params["embeddings"][col] @ w1_slice)     # (nc, 512) f32
        offsets.append(off)
        sizes.append(num_categories)
        row += embed_dim
        off += num_categories
    if t_blocks:
        params["t_all"] = jnp.concatenate(t_blocks, axis=0).astype(jnp.bfloat16)
    params["w1n"] = w1_f32[row:].astype(jnp.bfloat16)             # (num_numerical, 512)

    # Output layer weights padded to 8 sublanes (row 0 = real weights).
    wo = jnp.zeros((8, 128), jnp.float32).at[0].set(raw["out_w"][0])
    params["wo"] = wo
    params["bo"] = raw["out_b"].reshape(1, 1).astype(jnp.float32)
    params["cat_cols"] = cat_cols
    params["cat_offsets"] = tuple(offsets)
    params["cat_sizes"] = tuple(sizes)
    params["num_numerical"] = num_numerical_features
    params["total_input_dim"] = total_input_dim
    params["raw"] = raw
    return params


def new_user_predictor_forward(params, numerical_feats, categorical_feats_dict):
    """Whole forward (embedding lookup + MLP) runs inside one Pallas kernel."""
    cat_idx = [categorical_feats_dict[col] for col in params["cat_cols"]]
    return fused_mlp(params, numerical_feats.astype(jnp.float32), cat_idx)


# ----------------------------------------------------------------------------
# Pure-JAX references for correctness checks
# ----------------------------------------------------------------------------
def reference_forward_folded(params, numerical_feats, categorical_feats_dict):
    """Same math as the kernel (bf16 weights, f32 accumulation), plain JAX."""
    x = numerical_feats.astype(jnp.bfloat16)
    h1 = jnp.dot(x, params["w1n"], preferred_element_type=jnp.float32)
    if params["cat_cols"]:
        t_all_f32 = params["t_all"].astype(jnp.float32)
        for col, off in zip(params["cat_cols"], params["cat_offsets"]):
            idx = categorical_feats_dict[col].astype(jnp.int32)
            h1 = h1 + t_all_f32[off + idx]      # == one-hot @ t_all
    h1 = jnp.maximum(h1 + params["b1"], 0.0)
    h2 = jnp.maximum(jnp.dot(h1.astype(jnp.bfloat16), params["w2"],
                             preferred_element_type=jnp.float32)
                     + params["b2"], 0.0)
    h3 = jnp.maximum(jnp.dot(h2.astype(jnp.bfloat16), params["w3"],
                             preferred_element_type=jnp.float32)
                     + params["b3"], 0.0)
    return h3 @ params["wo"][0:1].T + params["bo"]


def reference_forward_f32(params, numerical_feats, categorical_feats_dict):
    """PyTorch-equivalent eval-mode forward in plain f32 JAX."""
    embedded = []
    for col in sorted(categorical_feats_dict.keys()):
        if col in params["embeddings"]:
            embedded.append(jnp.take(params["embeddings"][col],
                                     categorical_feats_dict[col], axis=0))
    x = jnp.concatenate(embedded + [numerical_feats.astype(jnp.float32)], axis=1)
    raw = params["raw"]
    eps = 1e-5

    def bn(h):  # gamma=1, beta=0, mean=0, var=1
        return h / jnp.sqrt(1.0 + eps)

    h = jnp.maximum(bn(x @ raw["fc1_w"].T + raw["fc1_b"]), 0.0)
    h = jnp.maximum(bn(h @ raw["fc2_w"].T + raw["fc2_b"]), 0.0)
    h = jnp.maximum(bn(h @ raw["fc3_w"].T + raw["fc3_b"]), 0.0)
    return h @ raw["out_w"].T + raw["out_b"]


# ----------------------------------------------------------------------------
# TODO(synk): dropout / BatchNorm batch-statistics are training-mode only; this
# kernel implements the eval-mode forward (dropout = identity, BN = running stats).
if __name__ == "__main__":
    key = jax.random.PRNGKey(0)
    k_params, k_num, k_c1, k_c2 = jax.random.split(key, 4)

    B = 8
    num_numerical_features = 16
    embedding_dims = {
        "country": (10, 8),
        "device": (6, 8),
    }

    params = init_params(k_params, num_numerical_features, embedding_dims)

    numerical_feats = jax.random.normal(k_num, (B, num_numerical_features),
                                        jnp.float32)
    categorical_feats_dict = {
        "country": jax.random.randint(k_c1, (B,), 0, 10),
        "device": jax.random.randint(k_c2, (B,), 0, 6),
    }

    out = new_user_predictor_forward(params, numerical_feats,
                                     categorical_feats_dict)
    out = jax.block_until_ready(out)
    assert out.shape == (B, 1), out.shape

    # Tight check against a plain-JAX version of the *same* folded bf16 math.
    ref_folded = reference_forward_folded(params, numerical_feats,
                                          categorical_feats_dict)
    assert jnp.allclose(out, ref_folded, atol=3e-2, rtol=3e-2), (
        float(jnp.max(jnp.abs(out - ref_folded))))

    # Loose sanity check against the f32 PyTorch-equivalent forward
    # (difference comes only from the bf16 weight/activation casts).
    ref_f32 = reference_forward_f32(params, numerical_feats,
                                    categorical_feats_dict)
    assert jnp.allclose(out, ref_f32, atol=1e-1, rtol=1e-1), (
        float(jnp.max(jnp.abs(out - ref_f32))))

    print("KERNEL_OK")
</pallas_src>

<mosaic_0001>
module attributes {stable_mosaic.version = 11 : i64} {
  func.func @kernel(%arg0: i32, %arg1: memref<16x1xi32, #tpu.memory_space<vmem>>, %arg2: memref<16x1xi32, #tpu.memory_space<vmem>>, %arg3: memref<16x16xbf16, #tpu.memory_space<vmem>>, %arg4: memref<16x512xbf16, #tpu.memory_space<vmem>>, %arg5: memref<16x512xbf16, #tpu.memory_space<vmem>>, %arg6: memref<1x512xf32, #tpu.memory_space<vmem>>, %arg7: memref<512x256xbf16, #tpu.memory_space<vmem>>, %arg8: memref<1x256xf32, #tpu.memory_space<vmem>>, %arg9: memref<256x128xbf16, #tpu.memory_space<vmem>>, %arg10: memref<1x128xf32, #tpu.memory_space<vmem>>, %arg11: memref<8x128xf32, #tpu.memory_space<vmem>>, %arg12: memref<1x1xf32, #tpu.memory_space<smem>>, %arg13: memref<1x1x16xf32, #tpu.memory_space<vmem>>) attributes {dimension_semantics = [#tpu.dimension_semantics<parallel>], iteration_bounds = array<i64: 1>, scalar_prefetch = 0 : i64, scratch_operands = 0 : i64, tpu.core_type = #tpu.core_type<tc>, window_params = [{transform_indices = @transform_0, window_bounds = array<i64: 16, 1>}, {transform_indices = @transform_1, window_bounds = array<i64: 16, 1>}, {transform_indices = @transform_2, window_bounds = array<i64: 16, 16>}, {pipeline_mode = #tpu.pipeline_mode<synchronous>, transform_indices = @transform_3, window_bounds = array<i64: 16, 512>}, {pipeline_mode = #tpu.pipeline_mode<synchronous>, transform_indices = @transform_4, window_bounds = array<i64: 16, 512>}, {pipeline_mode = #tpu.pipeline_mode<synchronous>, transform_indices = @transform_5, window_bounds = array<i64: 1, 512>}, {pipeline_mode = #tpu.pipeline_mode<synchronous>, transform_indices = @transform_6, window_bounds = array<i64: 512, 256>}, {pipeline_mode = #tpu.pipeline_mode<synchronous>, transform_indices = @transform_7, window_bounds = array<i64: 1, 256>}, {pipeline_mode = #tpu.pipeline_mode<synchronous>, transform_indices = @transform_8, window_bounds = array<i64: 256, 128>}, {pipeline_mode = #tpu.pipeline_mode<synchronous>, transform_indices = @transform_9, window_bounds = array<i64: 1, 128>}, {pipeline_mode = #tpu.pipeline_mode<synchronous>, transform_indices = @transform_10, window_bounds = array<i64: 8, 128>}, {transform_indices = @transform_11, window_bounds = array<i64: 1, 1>}, {transform_indices = @transform_12, window_bounds = array<i64: 1, 1, 16>}]} {
    %c0 = arith.constant 0 : index
    %c0_0 = arith.constant 0 : index
    %0 = vector.load %arg3[%c0, %c0_0] : memref<16x16xbf16, #tpu.memory_space<vmem>>, vector<16x16xbf16>
    %c0_1 = arith.constant 0 : index
    %c0_2 = arith.constant 0 : index
    %1 = vector.load %arg5[%c0_1, %c0_2] : memref<16x512xbf16, #tpu.memory_space<vmem>>, vector<16x512xbf16>
    %cst = arith.constant dense<0.000000e+00> : vector<16x512xf32>
    %2 = tpu.matmul %0, %1, %cst {dimension_numbers = #tpu.dot_dimension_numbers<[1], [0], [0], [1], [0, 0, 1, 1], [], []>} : vector<16x16xbf16>, vector<16x512xbf16>, vector<16x512xf32> -> vector<16x512xf32>
    %3 = tpu.iota {dimensions = array<i32: 1>} : vector<16x16xi32>
    %c0_3 = arith.constant 0 : index
    %c0_4 = arith.constant 0 : index
    %4 = vector.load %arg1[%c0_3, %c0_4] : memref<16x1xi32, #tpu.memory_space<vmem>>, vector<16x1xi32>
    %c0_i32 = arith.constant 0 : i32
    %5 = vector.broadcast %c0_i32 : i32 to vector<16x1xi32>
    %6 = arith.addi %4, %5 : vector<16x1xi32>
    %7 = vector.broadcast %6 : vector<16x1xi32> to vector<16x16xi32>
    %8 = arith.cmpi eq, %3, %7 : vector<16x16xi32>
    %c0_5 = arith.constant 0 : index
    %c0_6 = arith.constant 0 : index
    %9 = vector.load %arg2[%c0_5, %c0_6] : memref<16x1xi32, #tpu.memory_space<vmem>>, vector<16x1xi32>
    %c10_i32 = arith.constant 10 : i32
    %10 = vector.broadcast %c10_i32 : i32 to vector<16x1xi32>
    %11 = arith.addi %9, %10 : vector<16x1xi32>
    %12 = vector.broadcast %11 : vector<16x1xi32> to vector<16x16xi32>
    %13 = arith.cmpi eq, %3, %12 : vector<16x16xi32>
    %14 = arith.ori %8, %13 : vector<16x16xi1>
    %cst_7 = arith.constant 1.000000e+00 : f32
    %cst_8 = arith.constant 0.000000e+00 : f32
    %15 = vector.broadcast %cst_7 : f32 to vector<16x16xf32>
    %16 = vector.broadcast %cst_8 : f32 to vector<16x16xf32>
    %17 = arith.select %14, %15, %16 : vector<16x16xi1>, vector<16x16xf32>
    %18 = arith.truncf %17 : vector<16x16xf32> to vector<16x16xbf16>
    %c0_9 = arith.constant 0 : index
    %c0_10 = arith.constant 0 : index
    %19 = vector.load %arg4[%c0_9, %c0_10] : memref<16x512xbf16, #tpu.memory_space<vmem>>, vector<16x512xbf16>
    %cst_11 = arith.constant dense<0.000000e+00> : vector<16x512xf32>
    %20 = tpu.matmul %18, %19, %cst_11 {dimension_numbers = #tpu.dot_dimension_numbers<[1], [0], [0], [1], [0, 0, 1, 1], [], []>} : vector<16x16xbf16>, vector<16x512xbf16>, vector<16x512xf32> -> vector<16x512xf32>
    %21 = arith.addf %2, %20 : vector<16x512xf32>
    %c0_12 = arith.constant 0 : index
    %c0_13 = arith.constant 0 : index
    %22 = vector.load %arg6[%c0_12, %c0_13] : memref<1x512xf32, #tpu.memory_space<vmem>>, vector<1x512xf32>
    %23 = vector.broadcast %22 : vector<1x512xf32> to vector<16x512xf32>
    %24 = arith.addf %21, %23 : vector<16x512xf32>
    %cst_14 = arith.constant 0.000000e+00 : f32
    %25 = vector.broadcast %cst_14 : f32 to vector<16x512xf32>
    %26 = arith.maximumf %24, %25 : vector<16x512xf32>
    %27 = arith.truncf %26 : vector<16x512xf32> to vector<16x512xbf16>
    %c0_15 = arith.constant 0 : index
    %c0_16 = arith.constant 0 : index
    %28 = vector.load %arg7[%c0_15, %c0_16] : memref<512x256xbf16, #tpu.memory_space<vmem>>, vector<512x256xbf16>
    %cst_17 = arith.constant dense<0.000000e+00> : vector<16x256xf32>
    %29 = tpu.matmul %27, %28, %cst_17 {dimension_numbers = #tpu.dot_dimension_numbers<[1], [0], [0], [1], [0, 0, 1, 1], [], []>} : vector<16x512xbf16>, vector<512x256xbf16>, vector<16x256xf32> -> vector<16x256xf32>
    %c0_18 = arith.constant 0 : index
    %c0_19 = arith.constant 0 : index
    %30 = vector.load %arg8[%c0_18, %c0_19] : memref<1x256xf32, #tpu.memory_space<vmem>>, vector<1x256xf32>
    %31 = vector.broadcast %30 : vector<1x256xf32> to vector<16x256xf32>
    %32 = arith.addf %29, %31 : vector<16x256xf32>
    %cst_20 = arith.constant 0.000000e+00 : f32
    %33 = vector.broadcast %cst_20 : f32 to vector<16x256xf32>
    %34 = arith.maximumf %32, %33 : vector<16x256xf32>
    %35 = arith.truncf %34 : vector<16x256xf32> to vector<16x256xbf16>
    %c0_21 = arith.constant 0 : index
    %c0_22 = arith.constant 0 : index
    %36 = vector.load %arg9[%c0_21, %c0_22] : memref<256x128xbf16, #tpu.memory_space<vmem>>, vector<256x128xbf16>
    %cst_23 = arith.constant dense<0.000000e+00> : vector<16x128xf32>
    %37 = tpu.matmul %35, %36, %cst_23 {dimension_numbers = #tpu.dot_dimension_numbers<[1], [0], [0], [1], [0, 0, 1, 1], [], []>} : vector<16x256xbf16>, vector<256x128xbf16>, vector<16x128xf32> -> vector<16x128xf32>
    %c0_24 = arith.constant 0 : index
    %c0_25 = arith.constant 0 : index
    %38 = vector.load %arg10[%c0_24, %c0_25] : memref<1x128xf32, #tpu.memory_space<vmem>>, vector<1x128xf32>
    %39 = vector.broadcast %38 : vector<1x128xf32> to vector<16x128xf32>
    %40 = arith.addf %37, %39 : vector<16x128xf32>
    %cst_26 = arith.constant 0.000000e+00 : f32
    %41 = vector.broadcast %cst_26 : f32 to vector<16x128xf32>
    %42 = arith.maximumf %40, %41 : vector<16x128xf32>
    %c0_27 = arith.constant 0 : index
    %c0_28 = arith.constant 0 : index
    %43 = vector.load %arg11[%c0_27, %c0_28] : memref<8x128xf32, #tpu.memory_space<vmem>>, vector<8x128xf32>
    %cst_29 = arith.constant dense<0.000000e+00> : vector<8x16xf32>
    %44 = tpu.matmul %43, %42, %cst_29 {dimension_numbers = #tpu.dot_dimension_numbers<[1], [1], [0], [0], [0, 0, 1, 0], [], []>} : vector<8x128xf32>, vector<16x128xf32>, vector<8x16xf32> -> vector<8x16xf32>
    %45 = vector.extract_strided_slice %44 {offsets = [0, 0], sizes = [1, 16], strides = [1, 1]} : vector<8x16xf32> to vector<1x16xf32>
    %c0_30 = arith.constant 0 : index
    %c0_31 = arith.constant 0 : index
    %46 = memref.load %arg12[%c0_30, %c0_31] : memref<1x1xf32, #tpu.memory_space<smem>>
    %47 = vector.broadcast %46 : f32 to vector<1x16xf32>
    %48 = arith.addf %45, %47 : vector<1x16xf32>
    %c0_32 = arith.constant 0 : index
    %c0_33 = arith.constant 0 : index
    %c0_34 = arith.constant 0 : index
    %49 = vector.load %arg13[%c0_32, %c0_33, %c0_34] : memref<1x1x16xf32, #tpu.memory_space<vmem>>, vector<1x1x16xf32>
    %50 = vector.shape_cast %49 : vector<1x1x16xf32> to vector<1x16xf32>
    %51 = vector.shape_cast %48 : vector<1x16xf32> to vector<1x1x16xf32>
    tpu.vector_store %arg13[%c0_32, %c0_33, %c0_34], %51 {strides = array<i32>} : memref<1x1x16xf32, #tpu.memory_space<vmem>>, vector<1x1x16xf32>,
    return
  }
  func.func @transform_0(%arg0: i32) -> (i32, i32) {
    %c0_i32 = arith.constant 0 : i32
    %c0_i32_0 = arith.constant 0 : i32
    return %arg0, %c0_i32 : i32, i32
  }
  func.func @transform_1(%arg0: i32) -> (i32, i32) {
    %c0_i32 = arith.constant 0 : i32
    %c0_i32_0 = arith.constant 0 : i32
    return %arg0, %c0_i32 : i32, i32
  }
  func.func @transform_2(%arg0: i32) -> (i32, i32) {
    %c0_i32 = arith.constant 0 : i32
    %c0_i32_0 = arith.constant 0 : i32
    return %arg0, %c0_i32 : i32, i32
  }
  func.func @transform_3(%arg0: i32) -> (i32, i32) {
    %c0_i32 = arith.constant 0 : i32
    %c0_i32_0 = arith.constant 0 : i32
    %c0_i32_1 = arith.constant 0 : i32
    return %c0_i32, %c0_i32_0 : i32, i32
  }
  func.func @transform_4(%arg0: i32) -> (i32, i32) {
    %c0_i32 = arith.constant 0 : i32
    %c0_i32_0 = arith.constant 0 : i32
    %c0_i32_1 = arith.constant 0 : i32
    return %c0_i32, %c0_i32_0 : i32, i32
  }
  func.func @transform_5(%arg0: i32) -> (i32, i32) {
    %c0_i32 = arith.constant 0 : i32
    %c0_i32_0 = arith.constant 0 : i32
    %c0_i32_1 = arith.constant 0 : i32
    return %c0_i32, %c0_i32_0 : i32, i32
  }
  func.func @transform_6(%arg0: i32) -> (i32, i32) {
    %c0_i32 = arith.constant 0 : i32
    %c0_i32_0 = arith.constant 0 : i32
    %c0_i32_1 = arith.constant 0 : i32
    return %c0_i32, %c0_i32_0 : i32, i32
  }
  func.func @transform_7(%arg0: i32) -> (i32, i32) {
    %c0_i32 = arith.constant 0 : i32
    %c0_i32_0 = arith.constant 0 : i32
    %c0_i32_1 = arith.constant 0 : i32
    return %c0_i32, %c0_i32_0 : i32, i32
  }
  func.func @transform_8(%arg0: i32) -> (i32, i32) {
    %c0_i32 = arith.constant 0 : i32
    %c0_i32_0 = arith.constant 0 : i32
    %c0_i32_1 = arith.constant 0 : i32
    return %c0_i32, %c0_i32_0 : i32, i32
  }
  func.func @transform_9(%arg0: i32) -> (i32, i32) {
    %c0_i32 = arith.constant 0 : i32
    %c0_i32_0 = arith.constant 0 : i32
    %c0_i32_1 = arith.constant 0 : i32
    return %c0_i32, %c0_i32_0 : i32, i32
  }
  func.func @transform_10(%arg0: i32) -> (i32, i32) {
    %c0_i32 = arith.constant 0 : i32
    %c0_i32_0 = arith.constant 0 : i32
    %c0_i32_1 = arith.constant 0 : i32
    return %c0_i32, %c0_i32_0 : i32, i32
  }
  func.func @transform_11(%arg0: i32) -> (i32, i32) {
    %c0_i32 = arith.constant 0 : i32
    %c0_i32_0 = arith.constant 0 : i32
    %c0_i32_1 = arith.constant 0 : i32
    return %c0_i32, %c0_i32_0 : i32, i32
  }
  func.func @transform_12(%arg0: i32) -> (i32, i32, i32) {
    %c0_i32 = arith.constant 0 : i32
    %c0_i32_0 = arith.constant 0 : i32
    %c0_i32_1 = arith.constant 0 : i32
    return %arg0, %c0_i32, %c0_i32_0 : i32, i32, i32
  }
}

</mosaic_0001>

<bundles_post_ra>
// kernel: tpu_custom_call.1
= control target key start
LH: loop header
LB: loop body
LE: loop exit
PB: predicated region body
PF: predicated region fallthrough
CT: control target
= control target key end

     0   :  { %18 = vsyncpa [#allocation4], 0  ;;  %s1726_s0 = inlined_call_operand.vmem [shape: s32[16,1], index: 0, kind: input, shape index: {}]   ;;  %s1727_s1 = inlined_call_operand.vmem [shape: s32[16,1], index: 1, kind: input, shape index: {}]   ;;  %s1728_s2 = inlined_call_operand.vmem [shape: bf16[16,16], index: 2, kind: input, shape index: {}]   ;;  %s1729_s3 = inlined_call_operand.vmem [shape: bf16[16,512], index: 3, kind: input, shape index: {}]   ;;  %s1730_s4 = inlined_call_operand.hbm [shape: bf16[16,512], index: 4, kind: input, shape index: {}]   ;;  %s1731_s5 = inlined_call_operand.vmem [shape: f32[1,512], index: 5, kind: input, shape index: {}]   ;;  %s1732_s6 = inlined_call_operand.hbm [shape: bf16[512,256], index: 6, kind: input, shape index: {}]   ;;  %s1733_s7 = inlined_call_operand.vmem [shape: f32[1,256], index: 7, kind: input, shape index: {}]   ;;  %s1734_s8 = inlined_call_operand.hbm [shape: bf16[256,128], index: 8, kind: input, shape index: {}]   ;;  %s1735_s9 = inlined_call_operand.vmem [shape: f32[1,128], index: 9, kind: input, shape index: {}]   ;;  %s1736_s10 = inlined_call_operand.vmem [shape: f32[8,128], index: 10, kind: input, shape index: {}]   ;;  %s1737_s11 = inlined_call_operand.<no memory space> [shape: f32[1,1], index: 11, kind: input, shape index: {}]   ;;  %s1738_s12 = inlined_call_operand.hbm [shape: f32[1,1,16], index: 12, kind: output, shape index: {}]  }
   0x1   :  { %19 = vsyncpa [#allocation7], 0 }
   0x2   :  { %20 = vsyncpa [#allocation5], 0  ;;  %s1528_s21 = smov [#allocation6]   ;;  %s1434_s25 = scalar_lea.hbm %s1732_s6, 8192 }
   0x3   :  { %s48_s22 = sshll.u32 %s1528_s21, 4  ;;  %p1435_p0 = scmp.ne.s32.totalorder %s1732_s6, %s1434_s25  ;;  %s49_s22 = int_to_ptr.vmem [resolvable:$true] %s48_s22 }
   0x4   :  { %p1438_p1 = scmp.lt.u32.totalorder %s1434_s25, %s1732_s6 }
   0x6   :  { %p1440_p2 = pnand %p1438_p1, %p1435_p0 }
   0x8   :  { %1443 = shalt.err (!%p1440_p2)
}
   0x9   :  { %s1444_s30 = scalar_lea.vmem %s49_s22, 8192  ;;  %p1449_p4 = scmp.lt.s32.totalorder %s49_s22, %s49_s22 }
   0xa   :  { %p1445_p3 = scmp.ne.s32.totalorder %s49_s22, %s1444_s30  ;;  %p1450_p5 = scmp.lt.s32.totalorder %s1444_s30, %s1444_s30 }
   0xc   :  { %p1451_p6 = por %p1450_p5, %p1449_p4 }
   0xe   :  { %p1452_p7 = pnand %p1451_p6, %p1445_p3 }
  0x10   :  { %1455 = shalt.err (!%p1452_p7)
}
  0x11   :  { %s1529_s13 = smov 128   ;;  %s1530_s14 = smov 8  }
  0x12   :  { %54 = dma.hbm_to_vmem [thread:$0]  %s1732_s6, 8192, %s49_s22, [#allocation7], %s1529_s13, %s1529_s13, %s1530_s14  }
  0x13   :  { %s1531_s17 = smov [#allocation3]   ;;  %s1456_s21 = scalar_lea.hbm %s1730_s4, 512 }
  0x14   :  { %s34_s18 = sshll.u32 %s1531_s17, 4  ;;  %p1457_p8 = scmp.ne.s32.totalorder %s1730_s4, %s1456_s21  ;;  %s35_s18 = int_to_ptr.vmem [resolvable:$true] %s34_s18 }
  0x15   :  { %p1460_p9 = scmp.lt.u32.totalorder %s1456_s21, %s1730_s4 }
  0x17   :  { %p1462_p10 = pnand %p1460_p9, %p1457_p8 }
  0x19   :  { %1465 = shalt.err (!%p1462_p10)
}
  0x1a   :  { %s1466_s27 = scalar_lea.vmem %s35_s18, 512  ;;  %p1471_p12 = scmp.lt.s32.totalorder %s35_s18, %s35_s18 }
  0x1b   :  { %p1467_p11 = scmp.ne.s32.totalorder %s35_s18, %s1466_s27  ;;  %p1472_p13 = scmp.lt.s32.totalorder %s1466_s27, %s1466_s27 }
  0x1d   :  { %p1473_p0 = por %p1472_p13, %p1471_p12 }
  0x1f   :  { %p1474_p1 = pnand %p1473_p0, %p1467_p11 }
  0x21   :  { %1477 = shalt.err (!%p1474_p1)
}
  0x22   :  { %s1532_s6 = smov 256   ;;  %s1533_s22 = smov 16  }
  0x23   :  { %40 = dma.hbm_to_vmem [thread:$0]  %s1730_s4, 512, %s35_s18, [#allocation4], %s1532_s6, %s1532_s6, %s1533_s22  }
  0x24   :  { %s1534_s30 = smov [#allocation8]   ;;  %s1478_s16 = scalar_lea.hbm %s1734_s8, 2048 }
  0x25   :  { %s62_s13 = sshll.u32 %s1534_s30, 4  ;;  %p1479_p2 = scmp.ne.s32.totalorder %s1734_s8, %s1478_s16  ;;  %s63_s13 = int_to_ptr.vmem [resolvable:$true] %s62_s13 }
  0x26   :  { %p1482_p3 = scmp.lt.u32.totalorder %s1478_s16, %s1734_s8 }
  0x28   :  { %p1484_p4 = pnand %p1482_p3, %p1479_p2 }
  0x2a   :  { %1487 = shalt.err (!%p1484_p4)
}
  0x2b   :  { %s1488_s23 = scalar_lea.vmem %s63_s13, 2048  ;;  %p1493_p6 = scmp.lt.s32.totalorder %s63_s13, %s63_s13 }
  0x2c   :  { %p1489_p5 = scmp.ne.s32.totalorder %s63_s13, %s1488_s23  ;;  %p1494_p7 = scmp.lt.s32.totalorder %s1488_s23, %s1488_s23 }
  0x2e   :  { %p1495_p8 = por %p1494_p7, %p1493_p6 }
  0x30   :  { %p1496_p9 = pnand %p1495_p8, %p1489_p5 }
  0x32   :  { %1499 = shalt.err (!%p1496_p9)
}
  0x33   :  { %s1535_s4 = smov 64   ;;  %s1536_s18 = smov 4  }
  0x34   :  { %68 = dma.hbm_to_vmem [thread:$0]  %s1734_s8, 2048, %s63_s13, [#allocation7], %s1535_s4, %s1535_s4, %s1536_s18  }
  0x35   :  { %1522 = dma.done.wait [#allocation4], 512  }
  0x36   :  { %1523 = vsyncadd [#allocation4], 4294966784 }
  0x37   :  { %1524 = dma.done.wait [#allocation7], 10240  }
  0x38   :  { %1525 = vsyncadd [#allocation7], 4294957056  ;;  %v1537_v0 = vmov 0   ;;  %v93_v1 = vld [vmem:[%s1726_s0] sm:$0xff]  ;;  %v94_v3 = vld [vmem:[%s1726_s0 + $0x8] sm:$0xff]  ;;  %v91_v37 = vlaneseq  ;;  %v1538_v43 = vmov 0.0  }
  0x39   :  { %1307 = vset.pattern.permute.xlu0 %v1537_v0  ;;  %1308 = vset.pattern.permute.xlu1 %v1537_v0  ;;  %v103_v2 = vld [vmem:[%s1727_s1] sm:$0xff]  ;;  %v104_v5 = vld [vmem:[%s1727_s1 + $0x8] sm:$0xff]  ;;  %v1325_v12 = vld [vmem:[#allocation6 + $0x14] ss:$8 sps:$4 sm:$0xff]   ;;  %vm144_vm6 = vcmask 130048   ;;  %vm1540_vm7 = vmmov 0  }
  0x3a   :  { %180 = vmatprep.mubr.bf16.mxu0 %v1537_v0  ;;  %96 = vperm.xlu0 %1307, %v93_v1   ;;  %v105_v4 = vadd.s32 10, %v103_v2  ;;  %v106_v6 = vadd.s32 10, %v104_v5  ;;  %v1309_v7 = vld [vmem:[%s1729_s3 + $0x4] ss:$16 sps:$4 sm:$0xff]   ;;  %v1311_v8 = vld [vmem:[%s1729_s3] ss:$16 sps:$4 sm:$0xff]  }
  0x3b   :  { %148 = vmatprep.subr.bf16.mxu0 %v1309_v7  ;;  %v1314_v9 = vld [vmem:[%s1729_s3 + $0xc] ss:$16 sps:$4 sm:$0xff]   ;;  %v1324_v11 = vld [vmem:[#allocation6] ss:$8 sps:$4 sm:$0xff]   ;;  %v1327_v13 = vld [vmem:[#allocation6 + $0x10] ss:$8 sps:$4 sm:$0xff]  }
  0x3c   :  { %108 = vperm.xlu1 %1308, %v105_v4   ;;  %149 = vmatpush1.bf16.msra.mxu0 %v1311_v8  ;;  %v1322_v10 = vld [vmem:[#allocation6 + $0x4] ss:$8 sps:$4 sm:$0xff]   ;;  %v1333_v15 = vld [vmem:[#allocation6 + $0x20] ss:$8 sps:$4 sm:$0xff]   ;;  %v1334_v16 = vld [vmem:[#allocation6 + $0x34] ss:$8 sps:$4 sm:$0xff]  }
  0x3d   :  { %191 = vmatprep.subr.bf16.mxu0 %v1314_v9  ;;  %786 = vmatprep.subr.bf16.mxu1 %v1322_v10  ;;  %v1328_v14 = vld [vmem:[#allocation6 + $0x24] ss:$8 sps:$4 sm:$0xff]   ;;  %v1339_v17 = vld [vmem:[#allocation6 + $0x30] ss:$8 sps:$4 sm:$0xff]   ;;  %v1345_v19 = vld [vmem:[#allocation6 + $0x40] ss:$8 sps:$4 sm:$0xff]  }
  0x3e   :  { %99 = vperm.xlu0 %1307, %v94_v3   ;;  %787 = vmatpush1.bf16.msra.mxu1 %v1324_v11  ;;  %v1340_v18 = vld [vmem:[#allocation6 + $0x44] ss:$8 sps:$4 sm:$0xff]   ;;  %v1346_v20 = vld [vmem:[#allocation6 + $0x54] ss:$8 sps:$4 sm:$0xff]   ;;  %v1351_v21 = vld [vmem:[#allocation6 + $0x50] ss:$8 sps:$4 sm:$0xff]  }
  0x3f   :  { %788 = vmatprep.subr.bf16.mxu1 %v1325_v12  ;;  %v1352_v22 = vld [vmem:[#allocation6 + $0x64] ss:$8 sps:$4 sm:$0xff]   ;;  %v1357_v23 = vld [vmem:[#allocation6 + $0x60] ss:$8 sps:$4 sm:$0xff]   ;;  %v1358_v24 = vld [vmem:[#allocation6 + $0x74] ss:$8 sps:$4 sm:$0xff]  }
  0x40   :  { %111 = vperm.xlu1 %1308, %v106_v6   ;;  %v1363_v25 = vld [vmem:[#allocation6 + $0x70] ss:$8 sps:$4 sm:$0xff]   ;;  %v1364_v26 = vld [vmem:[#allocation6 + $0x84] ss:$8 sps:$4 sm:$0xff]   ;;  %v1369_v27 = vld [vmem:[#allocation6 + $0x80] ss:$8 sps:$4 sm:$0xff]  }
  0x41   :  { %v1370_v28 = vld [vmem:[#allocation6 + $0x94] ss:$8 sps:$4 sm:$0xff]   ;;  %v1375_v29 = vld [vmem:[#allocation6 + $0x90] ss:$8 sps:$4 sm:$0xff]   ;;  %v1376_v30 = vld [vmem:[#allocation6 + $0xa4] ss:$8 sps:$4 sm:$0xff]  }
  0x42   :  { %789 = vmatpush1.bf16.msra.mxu1 %v1327_v13  ;;  %v1381_v31 = vld [vmem:[#allocation6 + $0xa0] ss:$8 sps:$4 sm:$0xff]   ;;  %v1382_v32 = vld [vmem:[#allocation6 + $0xb4] ss:$8 sps:$4 sm:$0xff]   ;;  %v1387_v33 = vld [vmem:[#allocation6 + $0xb0] ss:$8 sps:$4 sm:$0xff]  }
  0x43   :  { %790 = vmatprep.subr.bf16.mxu1 %v1328_v14  ;;  %v1388_v34 = vld [vmem:[#allocation6 + $0xc4] ss:$8 sps:$4 sm:$0xff]   ;;  %v1393_v35 = vld [vmem:[#allocation6 + $0xc0] ss:$8 sps:$4 sm:$0xff]   ;;  %v1394_v36 = vld [vmem:[#allocation6 + $0xd4] ss:$8 sps:$4 sm:$0xff]  }
  0x44   :  { %v92_v38 = vand.u32 127, %v91_v37  ;;  %v1312_v46 = vld [vmem:[%s1729_s3 + $0x8] ss:$16 sps:$4 sm:$0xff]   ;;  %v1317_v48 = vld [vmem:[#allocation3 + $0x4] ss:$16 sps:$4 sm:$0xff]   ;;  %vm1130_vm8 = vcmask 122880  }
  0x45   :  { %v1315_v49 = vld [vmem:[#allocation3] ss:$16 sps:$4 sm:$0xff]   ;;  %v1321_v50 = vld [vmem:[#allocation3 + $0xc] ss:$16 sps:$4 sm:$0xff]   ;;  %v1319_v52 = vld [vmem:[#allocation3 + $0x8] ss:$16 sps:$4 sm:$0xff]  }
  0x46   :  { %791 = vmatpush1.bf16.msra.mxu1 %v1333_v15  ;;  %v1318_v51 = vld [vmem:[%s1728_s2] sm:$0xff]   ;;  %v1338_v55 = vld [vmem:[#allocation6 + $0x114] ss:$8 sps:$4 sm:$0xff]   ;;  %v1336_v56 = vld [vmem:[#allocation6 + $0x110] ss:$8 sps:$4 sm:$0xff]  }
  0x47   :  { %792 = vmatprep.subr.bf16.mxu1 %v1334_v16  ;;  %v1332_v53 = vld [vmem:[#allocation6 + $0x104] ss:$8 sps:$4 sm:$0xff]   ;;  %v1330_v54 = vld [vmem:[#allocation6 + $0x100] ss:$8 sps:$4 sm:$0xff]   ;;  %v1350_v59 = vld [vmem:[#allocation6 + $0x134] ss:$8 sps:$4 sm:$0xff]  }
  0x48   :  { %v1344_v57 = vld [vmem:[#allocation6 + $0x124] ss:$8 sps:$4 sm:$0xff]   ;;  %v1342_v58 = vld [vmem:[#allocation6 + $0x120] ss:$8 sps:$4 sm:$0xff]   ;;  %v1348_v60 = vld [vmem:[#allocation6 + $0x130] ss:$8 sps:$4 sm:$0xff]  }
  0x49   :  { %v1356_v61 = vld [vmem:[#allocation6 + $0x144] ss:$8 sps:$4 sm:$0xff]   ;;  %v1354_v62 = vld [vmem:[#allocation6 + $0x140] ss:$8 sps:$4 sm:$0xff]   ;;  %v1362_v63 = vld [vmem:[#allocation6 + $0x154] ss:$8 sps:$4 sm:$0xff]  }
  0x4a   :  { %793 = vmatpush1.bf16.msra.mxu1 %v1339_v17  ;;  %v1368_v1 = vld [vmem:[#allocation6 + $0x164] ss:$8 sps:$4 sm:$0xff]   ;;  %v1366_v2 = vld [vmem:[#allocation6 + $0x160] ss:$8 sps:$4 sm:$0xff]   ;;  %v1374_v3 = vld [vmem:[#allocation6 + $0x174] ss:$8 sps:$4 sm:$0xff]  }
  0x4b   :  { %794 = vmatprep.subr.bf16.mxu1 %v1340_v18  ;;  %v1372_v4 = vld [vmem:[#allocation6 + $0x170] ss:$8 sps:$4 sm:$0xff]   ;;  %v1380_v5 = vld [vmem:[#allocation6 + $0x184] ss:$8 sps:$4 sm:$0xff]   ;;  %v1378_v6 = vld [vmem:[#allocation6 + $0x180] ss:$8 sps:$4 sm:$0xff]  }
  0x4c   :  { %v1386_v7 = vld [vmem:[#allocation6 + $0x194] ss:$8 sps:$4 sm:$0xff]   ;;  %v1384_v8 = vld [vmem:[#allocation6 + $0x190] ss:$8 sps:$4 sm:$0xff]   ;;  %v1392_v9 = vld [vmem:[#allocation6 + $0x1a4] ss:$8 sps:$4 sm:$0xff]  }
  0x4d   :  { %v1390_v10 = vld [vmem:[#allocation6 + $0x1a0] ss:$8 sps:$4 sm:$0xff]   ;;  %v1398_v11 = vld [vmem:[#allocation6 + $0x1b4] ss:$8 sps:$4 sm:$0xff]   ;;  %v1396_v12 = vld [vmem:[#allocation6 + $0x1b0] ss:$8 sps:$4 sm:$0xff]  }
  0x4e   :  { %795 = vmatpush1.bf16.msra.mxu1 %v1345_v19  ;;  %v1399_v13 = vld [vmem:[#allocation6 + $0xd0] ss:$8 sps:$4 sm:$0xff]   ;;  %v1400_v14 = vld [vmem:[#allocation6 + $0xe4] ss:$8 sps:$4 sm:$0xff]   ;;  %v1402_v16 = vld [vmem:[#allocation6 + $0x1c0] ss:$8 sps:$4 sm:$0xff]  }
  0x4f   :  { %796 = vmatprep.subr.bf16.mxu1 %v1346_v20  ;;  %v1404_v15 = vld [vmem:[#allocation6 + $0x1c4] ss:$8 sps:$4 sm:$0xff]   ;;  %v1405_v17 = vld [vmem:[#allocation6 + $0xe0] ss:$8 sps:$4 sm:$0xff]   ;;  %v1406_v18 = vld [vmem:[#allocation6 + $0xf4] ss:$8 sps:$4 sm:$0xff]  }
  0x50   :  { %v1410_v19 = vld [vmem:[#allocation6 + $0x1d4] ss:$8 sps:$4 sm:$0xff]   ;;  %v1408_v20 = vld [vmem:[#allocation6 + $0x1d0] ss:$8 sps:$4 sm:$0xff]  }
  0x52   :  { %797 = vmatpush1.bf16.msra.mxu1 %v1351_v21  ;;  %v1411_v21 = vld [vmem:[#allocation6 + $0xf0] ss:$8 sps:$4 sm:$0xff]  }
  0x53   :  { %798 = vmatprep.subr.bf16.mxu1 %v1352_v22  ;;  %v1414_v22 = vld [vmem:[#allocation6 + $0x1e4] ss:$8 sps:$4 sm:$0xff]  }
  0x56   :  { %799 = vmatpush1.bf16.msra.mxu1 %v1357_v23  ;;  %v1412_v23 = vld [vmem:[#allocation6 + $0x1e0] ss:$8 sps:$4 sm:$0xff]  }
  0x57   :  { %800 = vmatprep.subr.bf16.mxu1 %v1358_v24  ;;  %v1417_v24 = vld [vmem:[#allocation6 + $0x1f4] ss:$8 sps:$4 sm:$0xff]  }
  0x5a   :  { %801 = vmatpush1.bf16.msra.mxu1 %v1363_v25  ;;  %v1415_v25 = vld [vmem:[#allocation6 + $0x1f0] ss:$8 sps:$4 sm:$0xff]  }
  0x5b   :  { %802 = vmatprep.subr.bf16.mxu1 %v1364_v26  ;;  %v1418_v26 = vld [vmem:[#allocation8 + $0x40] sm:$0xff]  }
  0x5e   :  { %803 = vmatpush1.bf16.msra.mxu1 %v1369_v27  ;;  %v1684_v27 = vshrl.u32 %v91_v37, 7 }
  0x5f   :  { %804 = vmatprep.subr.bf16.mxu1 %v1370_v28 }
  0x60   :  { %v352_v28 = vsub.s32 0, %v1684_v27 }
  0x62   :  { %805 = vmatpush1.bf16.msra.mxu1 %v1375_v29  ;;  %v348_v29 = vld [vmem:[%s1731_s5] sm:$0xf] }
  0x63   :  { %806 = vmatprep.subr.bf16.mxu1 %v1376_v30  ;;  %v356_v30 = vsub.s32 1, %v1684_v27 }
  0x66   :  { %807 = vmatpush1.bf16.msra.mxu1 %v1381_v31  ;;  %v353_v31 = vrot.slane %v348_v29, %v352_v28 }
  0x67   :  { %808 = vmatprep.subr.bf16.mxu1 %v1382_v32  ;;  %v357_v32 = vrot.slane %v348_v29, %v356_v30 }
  0x6a   :  { %809 = vmatpush1.bf16.msra.mxu1 %v1387_v33 }
  0x6b   :  { %810 = vmatprep.subr.bf16.mxu1 %v1388_v34 }
  0x6e   :  { %811 = vmatpush1.bf16.msra.mxu1 %v1393_v35 }
  0x6f   :  { %812 = vmatprep.subr.bf16.mxu1 %v1394_v36  ;;  %v360_v36 = vsub.s32 2, %v1684_v27 }
  0x72   :  { %813 = vmatpush1.bf16.msra.mxu1 %v1399_v13  ;;  %v1430_v13 = vld [vmem:[#allocation8 + $0x70] sm:$0xff]  }
  0x73   :  { %814 = vmatprep.subr.bf16.mxu1 %v1400_v14  ;;  %v1431_v14 = vld [vmem:[#allocation8 + $0x30] sm:$0xff]  }
  0x76   :  { %815 = vmatpush1.bf16.msra.mxu1 %v1405_v17  ;;  %v454_v17 = vld [vmem:[%s1733_s7] sm:$0x3] }
  0x77   :  { %816 = vmatprep.subr.bf16.mxu1 %v1406_v18  ;;  %v459_v18 = vrot.slane %v454_v17, %v352_v28 }
  0x7a   :  { %817 = vmatpush1.bf16.msra.mxu1 %v1411_v21 }
  0x7b   :  { %1242 = vmatprep.subr.bf16.mxu1 %v1418_v26 }
  0xb9   :  { %v97_v39 = vpop.permute.xlu0 %96 }
  0xba   :  { %vm101_vm0 = vcmp.eq.s32.totalorder %v92_v38, %v97_v39  ;;  %v364_v39 = vsub.s32 3, %v1684_v27  ;;  %v1539_v27 = vmov 0.0|0.0  }
  0xbb   :  { %v109_v40 = vpop.permute.xlu1 %108 }
  0xbc   :  { %vm113_vm1 = vcmp.eq.s32.totalorder %v92_v38, %v109_v40 }
  0xbd   :  { %v100_v41 = vpop.permute.xlu0 %99  ;;  %vm115_vm2 = vmor %vm101_vm0, %vm113_vm1 }
  0xbe   :  { %vm102_vm3 = vcmp.eq.s32.totalorder %v92_v38, %v100_v41  ;;  %v117_v44 = vsel %vm115_vm2, 1.0, %v1538_v43 }
  0xbf   :  { %v112_v42 = vpop.permute.xlu1 %111 }
  0xc0   :  { %vm114_vm4 = vcmp.eq.s32.totalorder %v92_v38, %v112_v42 }
  0xc1   :  { %vm116_vm5 = vmor %vm102_vm3, %vm114_vm4 }
  0xc2   :  { %v118_v45 = vsel %vm116_vm5, 1.0, %v1538_v43 }
  0xc3   :  { %v119_v47 = vpack.c.bf16 %v118_v45, %v117_v44 }
  0xc5   :  { %1152 = vmatmul.mubr.msk.bf16.vlgmr.msra.gmra.mrb[0].mxu0 %vm144_vm6, %v119_v47 }
  0xc6   :  { %192 = vmatpush1.bf16.msra.mxu0 %v1312_v46  ;;  %223 = vmatprep.mubr.bf16.mxu0 %v1537_v0  ;;  %v361_v46 = vrot.slane %v348_v29, %v360_v36 }
  0xc7   :  { %262 = vmatprep.subr.bf16.mxu0 %v1317_v48 }
  0xcd   :  { %1153 = vmatmul.mubr.msk.bf16.vlgmr.msra.gmra.mrb[4].mxu0 %vm144_vm6, %v119_v47 }
  0xce   :  { %263 = vmatpush1.bf16.msra.mxu0 %v1315_v49  ;;  %294 = vmatprep.mubr.bf16.mxu0 %v1537_v0  ;;  %v365_v49 = vrot.slane %v348_v29, %v364_v39 }
  0xcf   :  { %305 = vmatprep.subr.bf16.mxu0 %v1321_v50 }
  0xd5   :  { %1159 = vmatmul.mubr.msk.bf16.vlgmr.msra.gmra.mrb[0].mxu0 %vm144_vm6, %v1318_v51 }
  0xd6   :  { %306 = vmatpush1.bf16.msra.mxu0 %v1319_v52  ;;  %337 = vmatprep.mubr.bf16.mxu0 %v1537_v0  ;;  %v1360_v0 = vld [vmem:[#allocation6 + $0x150] ss:$8 sps:$4 sm:$0xff]  }
  0xd7   :  { %829 = vmatprep.subr.bf16.mxu0 %v1332_v53  ;;  %v1419_v53 = vld [vmem:[#allocation8] sm:$0xff]  }
  0xdd   :  { %1160 = vmatmul.mubr.msk.bf16.vlgmr.msra.gmra.mrb[4].mxu0 %vm144_vm6, %v1318_v51 }
  0xde   :  { %830 = vmatpush1.bf16.msra.mxu0 %v1330_v54 }
  0xdf   :  { %831 = vmatprep.subr.bf16.mxu0 %v1338_v55 }
  0xe2   :  { %832 = vmatpush1.bf16.msra.mxu0 %v1336_v56  ;;  %v1420_v56 = vld [vmem:[#allocation8 + $0x48] sm:$0xff]  }
  0xe3   :  { %833 = vmatprep.subr.bf16.mxu0 %v1344_v57 }
  0xe6   :  { %834 = vmatpush1.bf16.msra.mxu0 %v1342_v58 }
  0xe7   :  { %835 = vmatprep.subr.bf16.mxu0 %v1350_v59 }
  0xea   :  { %836 = vmatpush1.bf16.msra.mxu0 %v1348_v60 }
  0xeb   :  { %837 = vmatprep.subr.bf16.mxu0 %v1356_v61 }
  0xee   :  { %838 = vmatpush1.bf16.msra.mxu0 %v1354_v62  ;;  %v1421_v62 = vld [vmem:[#allocation8 + $0x8] sm:$0xff]  }
  0xef   :  { %839 = vmatprep.subr.bf16.mxu0 %v1362_v63 }
  0xf2   :  { %840 = vmatpush1.bf16.msra.mxu0 %v1360_v0 }
  0xf3   :  { %841 = vmatprep.subr.bf16.mxu0 %v1368_v1  ;;  %v1422_v1 = vld [vmem:[#allocation8 + $0x50] sm:$0xff]  }
  0xf6   :  { %842 = vmatpush1.bf16.msra.mxu0 %v1366_v2 }
  0xf7   :  { %843 = vmatprep.subr.bf16.mxu0 %v1374_v3 }
  0xfa   :  { %844 = vmatpush1.bf16.msra.mxu0 %v1372_v4 }
  0xfb   :  { %845 = vmatprep.subr.bf16.mxu0 %v1380_v5 }
  0xfe   :  { %846 = vmatpush1.bf16.msra.mxu0 %v1378_v6  ;;  %v1423_v6 = vld [vmem:[#allocation8 + $0x10] sm:$0xff]  }
  0xff   :  { %847 = vmatprep.subr.bf16.mxu0 %v1386_v7  ;;  %v1424_v7 = vld [vmem:[#allocation8 + $0x58] sm:$0xff]  }
 0x102   :  { %848 = vmatpush1.bf16.msra.mxu0 %v1384_v8  ;;  %v1425_v8 = vld [vmem:[#allocation8 + $0x18] sm:$0xff]  }
 0x103   :  { %849 = vmatprep.subr.bf16.mxu0 %v1392_v9  ;;  %v1426_v9 = vld [vmem:[#allocation8 + $0x60] sm:$0xff]  }
 0x106   :  { %850 = vmatpush1.bf16.msra.mxu0 %v1390_v10  ;;  %v1427_v10 = vld [vmem:[#allocation8 + $0x20] sm:$0xff]  }
 0x107   :  { %851 = vmatprep.subr.bf16.mxu0 %v1398_v11  ;;  %v1428_v11 = vld [vmem:[#allocation8 + $0x68] sm:$0xff]  }
 0x10a   :  { %852 = vmatpush1.bf16.msra.mxu0 %v1396_v12  ;;  %v1429_v12 = vld [vmem:[#allocation8 + $0x28] sm:$0xff]  }
 0x10b   :  { %853 = vmatprep.subr.bf16.mxu0 %v1404_v15  ;;  %v1432_v15 = vld [vmem:[#allocation8 + $0x78] sm:$0xff]  }
 0x10e   :  { %854 = vmatpush1.bf16.msra.mxu0 %v1402_v16  ;;  %v1433_v16 = vld [vmem:[#allocation8 + $0x38] sm:$0xff]  }
 0x10f   :  { %855 = vmatprep.subr.bf16.mxu0 %v1410_v19 }
 0x112   :  { %856 = vmatpush1.bf16.msra.mxu0 %v1408_v20 }
 0x113   :  { %857 = vmatprep.subr.bf16.mxu0 %v1414_v22 }
 0x116   :  { %858 = vmatpush1.bf16.msra.mxu0 %v1412_v23 }
 0x117   :  { %859 = vmatprep.subr.bf16.mxu0 %v1417_v24 }
 0x11a   :  { %860 = vmatpush1.bf16.msra.mxu0 %v1415_v25  ;;  %v463_v25 = vrot.slane %v454_v17, %v356_v30 }
 0x11b   :  { %1274 = vmatprep.subr.bf16.mxu0 %v1539_v27 }
 0x1a8   :  { %v296_v33 = vpop.f32.mrb[0].mxu0 }
 0x1a9   :  { %v370_v34 = vadd.f32 %v353_v31, %v296_v33  ;;  %v298_v35 = vpop.f32.mrb[1].mxu0 }
 0x1aa   :  { %v371_v37 = vadd.f32 %v357_v32, %v298_v35  ;;  %v300_v38 = vpop.f32.mrb[2].mxu0 }
 0x1ab   :  { %v374_v40 = vadd.f32 %v353_v31, %v300_v38  ;;  %v302_v41 = vpop.f32.mrb[3].mxu0  ;;  %v378_v44 = vmax.f32 %v370_v34, 0.0 }
 0x1ac   :  { %v375_v42 = vadd.f32 %v357_v32, %v302_v41  ;;  %v379_v47 = vmax.f32 %v371_v37, 0.0 }
 0x1ad   :  { %v382_v45 = vmax.f32 %v374_v40, 0.0 }
 0x1ae   :  { %v383_v48 = vmax.f32 %v375_v42, 0.0 }
 0x1af   :  { %v386_v50 = vpack.c.bf16 %v382_v45, %v378_v44  ;;  %v1225_v45 = vld [vmem:[%s1735_s9] ss:$0 sm:$0xff]  ;;  %s1541_s9 = smov [#allocation9]  }
 0x1b0   :  { %v339_v51 = vpop.f32.mrb[4].mxu0  ;;  %v387_v52 = vpack.c.bf16 %v383_v48, %v379_v47  ;;  %s1138_s27 = sshll.u32 %s1541_s9, 4  ;;  %s1139_s27 = int_to_ptr.vmem [resolvable:$true] %s1138_s27 }
 0x1b1   :  { %v372_v54 = vadd.f32 %v361_v46, %v339_v51  ;;  %v341_v55 = vpop.f32.mrb[5].mxu0  ;;  %s1500_s6 = scalar_lea.vmem %s1139_s27, 16  ;;  %s1504_s22 = scalar_lea.vmem %s1139_s27, 32 }
 0x1b2   :  { %v373_v57 = vadd.f32 %v365_v49, %v341_v55  ;;  %v343_v58 = vpop.f32.mrb[6].mxu0  ;;  %818 = vmatprep.mubr.bf16.mxu1 %v387_v52  ;;  %p1501_p10 = scmp.ne.s32.totalorder %s1139_s27, %s1500_s6  ;;  %p1505_p11 = scmp.lt.s32.totalorder %s1139_s27, %s1139_s27 }
 0x1b3   :  { %v376_v59 = vadd.f32 %v361_v46, %v343_v58  ;;  %v345_v60 = vpop.f32.mrb[7].mxu0  ;;  %819 = vmatmul.mubr.bf16.vlgmr.msra.gmra.mrb[0].mxu1 %v386_v50  ;;  %v380_v63 = vmax.f32 %v372_v54, 0.0  ;;  %p1506_p12 = scmp.lt.s32.totalorder %s1504_s22, %s1500_s6 }
 0x1b4   :  { %v377_v61 = vadd.f32 %v365_v49, %v345_v60  ;;  %1243 = vmatpush3.bf16.msra.mxu1 %v1419_v53  ;;  %v381_v2 = vmax.f32 %v373_v57, 0.0 }
 0x1b5   :  { %v384_v0 = vmax.f32 %v376_v59, 0.0  ;;  %1244 = vmatprep.subr.bf16.mxu1 %v1420_v56  ;;  %v1128_v56 = vstv %s1737_s11  ;;  %p1507_p13 = por %p1506_p12, %p1505_p11 }
 0x1b6   :  { %v385_v3 = vmax.f32 %v377_v61, 0.0 }
 0x1b7   :  { %v388_v4 = vpack.c.bf16 %v384_v0, %v380_v63  ;;  %p1508_p0 = pnand %p1507_p13, %p1501_p10 }
 0x1b8   :  { %v389_v5 = vpack.c.bf16 %v385_v3, %v381_v2  ;;  %1245 = vmatpush3.bf16.msra.mxu1 %v1421_v62 }
 0x1b9   :  { %1246 = vmatprep.subr.bf16.mxu1 %v1422_v1 }
 0x1ba   :  { %861 = vmatprep.mubr.bf16.mxu0 %v389_v5 }
 0x1bb   :  { %862 = vmatmul.mubr.bf16.vlgmr.msra.gmra.mrb[8].mxu0 %v388_v4 }
 0x1bc   :  { %1247 = vmatpush3.bf16.msra.mxu1 %v1423_v6  ;;  %1271 = vmatprep.mubr.msk.f32.mxu0 %vm1540_vm7, %v1538_v43  ;;  %v1056_v43 = vld [vmem:[%s1736_s10] sm:$0xff] }
 0x1bd   :  { %1248 = vmatprep.subr.bf16.mxu1 %v1424_v7 }
 0x1c0   :  { %1249 = vmatpush3.bf16.msra.mxu1 %v1425_v8 }
 0x1c1   :  { %1250 = vmatprep.subr.bf16.mxu1 %v1426_v9 }
 0x1c4   :  { %1251 = vmatpush3.bf16.msra.mxu1 %v1427_v10 }
 0x1c5   :  { %1252 = vmatprep.subr.bf16.mxu1 %v1428_v11 }
 0x1c8   :  { %1253 = vmatpush3.bf16.msra.mxu1 %v1429_v12 }
 0x1c9   :  { %1254 = vmatprep.subr.bf16.mxu1 %v1430_v13 }
 0x1cc   :  { %1255 = vmatpush3.bf16.msra.mxu1 %v1431_v14 }
 0x1cd   :  { %1256 = vmatprep.subr.bf16.mxu1 %v1432_v15 }
 0x1d0   :  { %1257 = vmatpush3.bf16.msra.mxu1 %v1433_v16 }
 0x286   :  { %v820_v19 = vpop.f32.mrb[0].mxu1 }
 0x287   :  { %v821_v20 = vadd.f32 %v820_v19, %v459_v18  ;;  %v822_v21 = vpop.f32.mrb[1].mxu1 }
 0x288   :  { %v824_v22 = vpop.f32.mrb[2].mxu1  ;;  %v823_v26 = vadd.f32 %v822_v21, %v463_v25 }
 0x289   :  { %v825_v23 = vadd.f32 %v824_v22, %v459_v18  ;;  %v826_v24 = vpop.f32.mrb[3].mxu1 }
 0x28a   :  { %v827_v33 = vadd.f32 %v826_v24, %v463_v25 }
 0x28e   :  { %v863_v29 = vpop.f32.mrb[8].mxu0 }
 0x28f   :  { %v864_v31 = vadd.f32 %v863_v29, %v821_v20  ;;  %v865_v32 = vpop.f32.mrb[9].mxu0 }
 0x290   :  { %v866_v34 = vadd.f32 %v865_v32, %v823_v26  ;;  %v867_v35 = vpop.f32.mrb[10].mxu0 }
 0x291   :  { %v868_v36 = vadd.f32 %v867_v35, %v825_v23  ;;  %v869_v37 = vpop.f32.mrb[11].mxu0  ;;  %v872_v28 = vmax.f32 %v864_v31, 0.0 }
 0x292   :  { %v870_v38 = vadd.f32 %v869_v37, %v827_v33  ;;  %v873_v40 = vmax.f32 %v866_v34, 0.0 }
 0x293   :  { %v874_v39 = vmax.f32 %v868_v36, 0.0 }
 0x294   :  { %v875_v41 = vmax.f32 %v870_v38, 0.0 }
 0x295   :  { %v876_v42 = vpack.c.bf16 %v874_v39, %v872_v28 }
 0x296   :  { %v877_v44 = vpack.c.bf16 %v875_v41, %v873_v40 }
 0x298   :  { %1045 = vmatprep.mubr.bf16.mxu1 %v877_v44 }
 0x299   :  { %1046 = vmatmul.mubr.bf16.vlgmr.msra.gmra.mrb[4].mxu1 %v876_v42 }
 0x36c   :  { %v1258_v30 = vpop.f32.mrb[4].mxu1 }
 0x36d   :  { %v1259_v46 = vpop.f32.mrb[5].mxu1 }
 0x36e   :  { %v1260_v47 = vadd.f32 %v1259_v46, %v1258_v30  ;;  %v1261_v48 = vpop.f32.mrb[6].mxu1 }
 0x36f   :  { %v1262_v49 = vpop.f32.mrb[7].mxu1 }
 0x370   :  { %v1048_v50 = vadd.f32 %v1260_v47, %v1225_v45  ;;  %v1263_v51 = vadd.f32 %v1262_v49, %v1261_v48 }
 0x372   :  { %v1051_v52 = vadd.f32 %v1263_v51, %v1225_v45  ;;  %v1054_v53 = vmax.f32 %v1048_v50, 0.0 }
 0x374   :  { %v1055_v54 = vmax.f32 %v1051_v52, 0.0 }
 0x376   :  { %v1275_v55 = vpack.c.bf16 %v1055_v54, %v1054_v53 }
 0x378   :  { %1276 = vmatpush3.bf16.xpose.msra.mxu0 %v1275_v55 }
 0x37f   :  { %1272 = vmatmul.mubr.f32.vlgmr.msra.gmra.mrb[12].mxu0 %v1056_v43 }
 0x452   :  { %v1123_v57 = vpop.f32.mrb[12].mxu0 }
 0x453   :  { %v1129_v58 = vadd.f32 %v1128_v56, %v1123_v57  ;;  %v1273_v59 = vpop.f32.mrb[13].mxu0 }
 0x455   :  { %1131 = vst.msk [vmem:[#allocation9] sm:$0x1] %vm1130_vm8, %v1129_v58 }
 0x456   :  { %1511 = shalt.err (!%p1508_p0)
}
 0x457   :  { %s1512_s11 = scalar_lea.hbm %s1738_s12, 16 }
 0x458   :  { %p1513_p1 = scmp.ne.s32.totalorder %s1738_s12, %s1512_s11  ;;  %p1516_p2 = scmp.lt.u32.totalorder %s1512_s11, %s1738_s12 }
 0x45a   :  { %p1518_p3 = pnand %p1516_p2, %p1513_p1 }
 0x45c   :  { %1521 = shalt.err (!%p1518_p3)
}
 0x45d   :  { %1141 = dma.vmem_to_hbm [thread:$0]  %s1139_s27, 16, %s1738_s12, [#allocation5]  }
 0x45e   :  { %1526 = dma.done.wait [#allocation5], 16  }
 0x45f   :  { %1527 = vsyncadd [#allocation5], 4294967280 }
 0x460   :  { %1145 = vsyncpa [#allocation4], 1 }
 0x461   :  { %1146 = vsyncpa [#allocation7], 1 }
 0x462   :  { %1147 = vsyncpa [#allocation5], 1 }

</bundles_post_ra>
